<compile_context>
chip_gen: v7x
topology: tpu7x:2x2x1
jax: 0.10.0
libtpu: 0.0.40
codegen_flags: <defaults>
</compile_context>

<pallas_src>
import jax
import jax.numpy as jnp
from jax.experimental import pallas as pl
from jax.experimental.pallas import tpu as pltpu

USE_BIAS = True
BATCH_NORM = True
BN_EPS = 1e-5
MXU_DTYPE = jnp.bfloat16        # MXU operand dtype; accumulation is always f32
LANE = 128


def _downsample_kernel(p_ref, w_ref, b_ref, o_ref):
    # p_ref: (1, K, tm)     patches^T (bf16); columns = output pixels (lane dim)
    # w_ref: (Cout, K)      folded weight  = conv_w * bn_scale        (bf16)
    # b_ref: (Cout, 1)      folded bias    = conv_b * bn_scale + bn_shift (f32)
    # o_ref: (1, Cout, tm)  lane-dense output tile
    acc = jnp.dot(w_ref[...], p_ref[0], preferred_element_type=jnp.float32)
    acc = acc + b_ref[...]                      # (Cout, 1) broadcasts over lanes
    o_ref[0] = jnp.maximum(acc, 0.0).astype(o_ref.dtype)


def _round_up(x, m):
    return ((x + m - 1) // m) * m


def _pick_tile(hw, k, cout, in_bytes, out_bytes,
               vmem_budget=20 * 1024 * 1024, tm_max=2048):
    """Largest pixel tile (multiple of 128) whose double-buffered footprint fits
    the VMEM budget (budget chosen conservatively for v7x's 64 MiB VMEM and
    v5e's 16 MiB scoped default is overridden via vmem_limit_bytes below)."""
    tm = tm_max
    while tm > LANE:
        footprint = (2 * k * tm * in_bytes          # patches tile, double buffered
                     + 2 * cout * tm * out_bytes    # output tile, double buffered
                     + 2 * k * cout * in_bytes)     # weight + bias, resident
        if footprint <= vmem_budget:
            break
        tm //= 2
    return min(tm, _round_up(hw, LANE))


def convolution_downsample(x_nchw, weight, bias, gamma, beta,
                           running_mean, running_var, *, mxu_dtype=MXU_DTYPE):
    N, Cin, H, W = x_nchw.shape
    Cout = weight.shape[0]
    Ho, Wo = H // 2, W // 2                 # PyTorch floors odd spatial dims
    K = 4 * Cin
    hw = Ho * Wo

    # ---- fold conv bias + eval-mode BN into one scale/shift, then into weight
    if BATCH_NORM:
        scale = gamma / jnp.sqrt(running_var + BN_EPS)
        shift = beta - running_mean * scale
    else:
        scale = jnp.ones((Cout,), jnp.float32)
        shift = jnp.zeros((Cout,), jnp.float32)
    b = bias if USE_BIAS else jnp.zeros((Cout,), jnp.float32)
    b_fold = (b * scale + shift).astype(jnp.float32).reshape(Cout, 1)

    # weight (Cout, Cin, kh, kw) -> (Cout, kh, kw, Cin) -> (Cout, K), BN-folded
    w_t = jnp.transpose(weight, (0, 2, 3, 1)).reshape(Cout, K)
    w_t = (w_t * scale.reshape(Cout, 1)).astype(mxu_dtype)

    # ---- patches^T per image: (N, K, Ho*Wo), K ordered (kh, kw, ci) like w_t
    x = x_nchw[:, :, :2 * Ho, :2 * Wo]
    p = x.reshape(N, Cin, Ho, 2, Wo, 2)
    p = jnp.transpose(p, (0, 3, 5, 1, 2, 4))      # (N, kh, kw, Cin, Ho, Wo)
    p = p.reshape(N, K, hw).astype(mxu_dtype)

    # ---- tiling over the pixel (lane) axis with padded tail (no divisibility asserts)
    in_bytes = jnp.dtype(mxu_dtype).itemsize
    out_bytes = jnp.dtype(x_nchw.dtype).itemsize
    tm = _pick_tile(hw, K, Cout, in_bytes, out_bytes)
    P = _round_up(hw, tm)
    if P != hw:
        p = jnp.pad(p, ((0, 0), (0, 0), (0, P - hw)))

    grid = (N, P // tm)

    out_flat = pl.pallas_call(
        _downsample_kernel,
        out_shape=jax.ShapeDtypeStruct((N, Cout, P), x_nchw.dtype),
        grid=grid,
        in_specs=[
            pl.BlockSpec((1, K, tm), lambda n, m: (n, 0, m)),    # patches^T tile
            pl.BlockSpec((Cout, K), lambda n, m: (0, 0)),        # folded weight
            pl.BlockSpec((Cout, 1), lambda n, m: (0, 0)),        # folded bias
        ],
        out_specs=pl.BlockSpec((1, Cout, tm), lambda n, m: (n, 0, m)),
        compiler_params=pltpu.CompilerParams(
            dimension_semantics=("parallel", "parallel"),
            vmem_limit_bytes=32 * 1024 * 1024),
        cost_estimate=pl.CostEstimate(
            flops=2 * N * hw * K * Cout,
            transcendentals=0,
            bytes_accessed=(N * K * P * in_bytes
                            + (K + 1) * Cout * in_bytes
                            + N * Cout * P * out_bytes)),
    )(p, w_t, b_fold)

    if P != hw:
        out_flat = out_flat[:, :, :hw]
    return out_flat.reshape(N, Cout, Ho, Wo)      # already NCHW: free reshape


if __name__ == "__main__":
    key = jax.random.PRNGKey(0)
    kx, kw, kb, kg, kbeta, km, kv = jax.random.split(key, 7)

    N, Cin, H, W = 2, 4, 16, 16
    Cout = 8

    x = jax.random.normal(kx, (N, Cin, H, W), jnp.float32)
    weight = jax.random.normal(kw, (Cout, Cin, 2, 2), jnp.float32) * 0.1
    bias = jax.random.normal(kb, (Cout,), jnp.float32) * 0.1
    gamma = 1.0 + 0.1 * jax.random.normal(kg, (Cout,), jnp.float32)
    beta = 0.1 * jax.random.normal(kbeta, (Cout,), jnp.float32)
    running_mean = 0.1 * jax.random.normal(km, (Cout,), jnp.float32)
    running_var = jnp.abs(1.0 + 0.1 * jax.random.normal(kv, (Cout,), jnp.float32))

    out = convolution_downsample(x, weight, bias, gamma, beta,
                                 running_mean, running_var)
    out = jax.block_until_ready(out)

    # pure-JAX reference (same semantics as PyTorch forward, eval-mode BN), f32
    ref = jax.lax.conv_general_dilated(
        x, weight, window_strides=(2, 2), padding="VALID",
        dimension_numbers=("NCHW", "OIHW", "NCHW"))
    if USE_BIAS:
        ref = ref + bias.reshape(1, -1, 1, 1)
    if BATCH_NORM:
        s = gamma / jnp.sqrt(running_var + BN_EPS)
        t = beta - running_mean * s
        ref = ref * s.reshape(1, -1, 1, 1) + t.reshape(1, -1, 1, 1)
    ref = jnp.maximum(ref, 0.0)

    assert out.shape == (N, Cout, H // 2, W // 2)
    # tolerance reflects bf16 MXU operands (f32 accumulation + f32 epilogue)
    assert jnp.allclose(out, ref, atol=3e-2, rtol=3e-2)
    print("KERNEL_OK")
</pallas_src>

<mosaic_0001>
module attributes {stable_mosaic.version = 11 : i64} {
  func.func @_downsample_kernel(%arg0: i32, %arg1: i32, %arg2: memref<1x16x128xbf16, #tpu.memory_space<vmem>>, %arg3: memref<8x16xbf16, #tpu.memory_space<vmem>>, %arg4: memref<8x1xf32, #tpu.memory_space<vmem>>, %arg5: memref<1x8x128xf32, #tpu.memory_space<vmem>>) attributes {dimension_semantics = [#tpu.dimension_semantics<parallel>, #tpu.dimension_semantics<parallel>], iteration_bounds = array<i64: 2, 1>, scalar_prefetch = 0 : i64, scratch_operands = 0 : i64, tpu.core_type = #tpu.core_type<tc>, window_params = [{transform_indices = @transform_0, window_bounds = array<i64: 1, 16, 128>}, {pipeline_mode = #tpu.pipeline_mode<synchronous>, transform_indices = @transform_1, window_bounds = array<i64: 8, 16>}, {pipeline_mode = #tpu.pipeline_mode<synchronous>, transform_indices = @transform_2, window_bounds = array<i64: 8, 1>}, {transform_indices = @transform_3, window_bounds = array<i64: 1, 8, 128>}]} {
    %c0 = arith.constant 0 : index
    %c0_0 = arith.constant 0 : index
    %0 = vector.load %arg3[%c0, %c0_0] : memref<8x16xbf16, #tpu.memory_space<vmem>>, vector<8x16xbf16>
    %c0_1 = arith.constant 0 : index
    %c0_2 = arith.constant 0 : index
    %c0_3 = arith.constant 0 : index
    %1 = vector.load %arg2[%c0_1, %c0_2, %c0_3] : memref<1x16x128xbf16, #tpu.memory_space<vmem>>, vector<1x16x128xbf16>
    %2 = vector.shape_cast %1 : vector<1x16x128xbf16> to vector<16x128xbf16>
    %cst = arith.constant dense<0.000000e+00> : vector<8x128xf32>
    %3 = tpu.matmul %0, %2, %cst {dimension_numbers = #tpu.dot_dimension_numbers<[1], [0], [0], [1], [0, 0, 1, 1], [], []>} : vector<8x16xbf16>, vector<16x128xbf16>, vector<8x128xf32> -> vector<8x128xf32>
    %c0_4 = arith.constant 0 : index
    %c0_5 = arith.constant 0 : index
    %4 = vector.load %arg4[%c0_4, %c0_5] : memref<8x1xf32, #tpu.memory_space<vmem>>, vector<8x1xf32>
    %5 = vector.broadcast %4 : vector<8x1xf32> to vector<8x128xf32>
    %6 = arith.addf %3, %5 : vector<8x128xf32>
    %cst_6 = arith.constant 0.000000e+00 : f32
    %7 = vector.broadcast %cst_6 : f32 to vector<8x128xf32>
    %8 = arith.maximumf %6, %7 : vector<8x128xf32>
    %c0_7 = arith.constant 0 : index
    %c0_8 = arith.constant 0 : index
    %c0_9 = arith.constant 0 : index
    %9 = vector.load %arg5[%c0_7, %c0_8, %c0_9] : memref<1x8x128xf32, #tpu.memory_space<vmem>>, vector<1x8x128xf32>
    %10 = vector.shape_cast %9 : vector<1x8x128xf32> to vector<8x128xf32>
    %11 = vector.shape_cast %8 : vector<8x128xf32> to vector<1x8x128xf32>
    tpu.vector_store %arg5[%c0_7, %c0_8, %c0_9], %11 {strides = array<i32>} : memref<1x8x128xf32, #tpu.memory_space<vmem>>, vector<1x8x128xf32>,
    return
  }
  func.func @transform_0(%arg0: i32, %arg1: i32) -> (i32, i32, i32) {
    %c0_i32 = arith.constant 0 : i32
    %c0_i32_0 = arith.constant 0 : i32
    return %arg0, %c0_i32, %arg1 : i32, i32, i32
  }
  func.func @transform_1(%arg0: i32, %arg1: i32) -> (i32, i32) {
    %c0_i32 = arith.constant 0 : i32
    %c0_i32_0 = arith.constant 0 : i32
    %c0_i32_1 = arith.constant 0 : i32
    return %c0_i32, %c0_i32_0 : i32, i32
  }
  func.func @transform_2(%arg0: i32, %arg1: i32) -> (i32, i32) {
    %c0_i32 = arith.constant 0 : i32
    %c0_i32_0 = arith.constant 0 : i32
    %c0_i32_1 = arith.constant 0 : i32
    return %c0_i32, %c0_i32_0 : i32, i32
  }
  func.func @transform_3(%arg0: i32, %arg1: i32) -> (i32, i32, i32) {
    %c0_i32 = arith.constant 0 : i32
    %c0_i32_0 = arith.constant 0 : i32
    return %arg0, %c0_i32, %arg1 : i32, i32, i32
  }
}

</mosaic_0001>

<bundles_post_ra>
// kernel: tpu_custom_call.1
= control target key start
LH: loop header
LB: loop body
LE: loop exit
PB: predicated region body
PF: predicated region fallthrough
CT: control target
= control target key end

     0   :  { %8 = vsyncpa [#allocation3], 0  ;;  %s778_s0 = inlined_call_operand.hbm [shape: bf16[2,16,128], index: 0, kind: input, shape index: {}]   ;;  %s779_s1 = inlined_call_operand.vmem [shape: bf16[8,16], index: 1, kind: input, shape index: {}]   ;;  %s780_s2 = inlined_call_operand.vmem [shape: f32[8,1], index: 2, kind: input, shape index: {}]   ;;  %s781_s3 = inlined_call_operand.hbm [shape: f32[2,8,128], index: 3, kind: output, shape index: {}]  }
   0x1   :  { %10 = vsyncpa [#allocation3 + $0x1], 0 }
   0x2   :  { %11 = vsyncpa [#allocation4], 0 }
   0x3   :  { %13 = vsyncpa [#allocation4 + $0x1], 0  ;;  %s599_s12 = smov 0   ;;  %s601_s13 = smov 0  }
   0x4   :  { %s603_s14 = smov 0   ;;  %s605_s15 = smov 0  }
   0x5   :  { %s607_s16 = smov 0   ;;  %s609_s17 = smov 0  }
   0x6 LB: > { %s364_s18 = sadd.s32 4294967295, %s570_s17   ;;  %s365_s19 = sadd.s32 4294967294, %s570_s17   ;;  %s570_s17 = sphi %s609_s17, %s19_s17   ;;  %s566_s16 = sphi %s607_s16, %s796_s16   ;;  %s562_s15 = sphi %s605_s15, %s795_s15   ;;  %s558_s14 = sphi %s603_s14, %s794_s14   ;;  %s554_s13 = sphi %s601_s13, %s793_s13   ;;  %s550_s12 = sphi %s599_s12, %s792_s12  }
   0x7   : > { %s31_s20 = sadd.s32 1, %s566_s16  ;;  %s40_s21 = sadd.s32 1, %s558_s14 }
   0x8   : > { %p33_p0 = scmp.ge.s32.totalorder %s31_s20, 2  ;;  %p47_p1 = scmp.ne.s32.totalorder %s558_s14, %s554_s13 }
   0x9   : > { %p48_p2 = scmp.eq.s32.totalorder %s570_s17, 0  ;;  %p53_p3 = scmp.ne.s32.totalorder %s554_s13, %s550_s12 }
   0xa   : > { %s798_s20 = smov (%p33_p0, %s31_s20), 0  ;;  %p54_p5 = scmp.eq.s32.totalorder %s364_s18, 0 }
   0xb   : > { %p640_p4 = por %p48_p2, %p47_p1  ;;  %s35_s23 = ssub.s32 %s566_s16, %s798_s20 }
   0xc   : > { %p121_p6 = scmp.eq.s32.totalorder %s364_s18, 1  ;;  %p38_p7 = scmp.eq.s32.totalorder %s35_s23, 0 }
   0xd   : > { %p646_p8 = por %p54_p5, %p53_p3  ;;  %p127_p10 = scmp.eq.s32.totalorder %s365_s19, 1 }
   0xe   : > { %p650_p9 = por %p121_p6, %p47_p1  ;;  %p401_p13 = scmp.lt.s32.totalorder %s570_s17, 2 }
   0xf   : > { %s655_s26 = scalar_select %p38_p7, %s558_s14, %s40_s21  }
  0x10   : > { %s785_s25 = scalar_select %p650_p9, 1, 0 }
  0x11   : > { %p657_p11 = por %p127_p10, %p53_p3  ;;  %s153_s28 = sand.u32 1, %s558_s14  }
  0x12   : > { %s368_s29 = sshll.u32 %s153_s28, 3  ;;  %s380_s30 = sshll.u32 %s566_s16, 7 }
  0x13   : > { %s786_s27 = scalar_select %p657_p11, 1, 0 }
  0x14   : > { %s668_s6 = scalar_lea.hbm %s778_s0, %s380_s30  ;;  %s157_s7 = scalar_lea.vmem [#allocation2], %s368_s29 }
  0x15   : > { %s165_s8 = sshll.u32 %s157_s7, 4  ;;  %p674_p0 = pnand %p401_p13, %p640_p4  ;;  %s670_s8 = int_to_ptr.vmem [resolvable:$true] %s165_s8 }
  0x16   : > { %s679_s10 = scalar_lea.sflag [#allocation3], %s153_s28  ;;  %s458_s11 = scalar_lea.hbm %s668_s6, 128 }
  0x17   : > { %p459_p2 = scmp.ne.s32.totalorder %s668_s6, %s458_s11  ;;  %p460_p3 = pneg %p674_p0 }
  0x18   : > { %s463_s21 = scalar_lea.hbm %s778_s0, 256  ;;  %p464_p4 = scmp.lt.u32.totalorder %s668_s6, %s778_s0 }
  0x19   : > { %p461_p5 = pnand %p460_p3, %p459_p2  ;;  %p465_p7 = scmp.lt.u32.totalorder %s463_s21, %s458_s11 }
  0x1a   : > { %p467_p13 = scmp.lt.u32.totalorder %s458_s11, %s668_s6 }
  0x1b   : > { %p462_p6 = pneg %p461_p5  ;;  %p466_p10 = por %p465_p7, %p464_p4 }
  0x1d   : > { %p468_p12 = por %p467_p13, %p466_p10 }
  0x1f   : > { %p469_p1 = pnand %p468_p12, %p462_p6 }
  0x21   : > { %472 = shalt.err (!%p469_p1)
}
  0x22   : > { %s473_s28 = scalar_lea.vmem %s670_s8, 128  ;;  %s572_s29 = smov [#allocation2]  }
  0x23   : > { %p474_p2 = scmp.ne.s32.totalorder %s670_s8, %s473_s28  ;;  %s478_s30 = sshll.u32 %s572_s29, 4  ;;  %s479_s30 = int_to_ptr.vmem [resolvable:$false] %s478_s30 }
  0x24   : > { %s480_s4 = scalar_lea.vmem %s479_s30, 256  ;;  %p481_p9 = scmp.lt.s32.totalorder %s670_s8, %s479_s30 }
  0x25   : > { %p476_p5 = pnand %p474_p2, %p460_p3  ;;  %p482_p4 = scmp.lt.s32.totalorder %s480_s4, %s473_s28 }
  0x27   : > { %p477_p11 = pneg %p476_p5  ;;  %p483_p7 = por %p482_p4, %p481_p9 }
  0x29   : > { %p484_p10 = pnand %p483_p7, %p477_p11 }
  0x2b   : > { %487 = shalt.err (!%p484_p10)
}
  0x2c   : > { %s573_s5 = smov 64   ;;  %s574_s7 = smov 4  }
  0x2d   : > { %396 = dma.hbm_to_vmem [thread:$0]  (!%p674_p0), %s668_s6, 128, %s670_s8, %s679_s10, %s573_s5, %s573_s5, %s574_s7  }
  0x2e   : > { %p173_p12 = scmp.lt.s32.totalorder %s570_s17, 3  ;;  %p788_p1 = scmp.ge.s32.totalorder %s570_s17, 1 }
  0x30   : > { %p174_p3 = pnand %p788_p1, %p173_p12 }
  0x31   : > { %s711_s11 = sand.u32 (!%p174_p3), 1, %s554_s13  }
  0x32   : > { %177 = sbr.rel (%p174_p3) target bundleno = 293 (0x125), region = 32  ;;  %s372_s18 = sshll.u32 (!%p174_p3), %s711_s11, 3 }
  0x33   : > { %s180_s19 = scalar_lea.sflag (!%p174_p3), [#allocation3], %s711_s11  ;;  %s183_s21 = scalar_lea.vmem (!%p174_p3), [#allocation2], %s372_s18 }
  0x39   : > { %541 = dma.done.wait (%p646_p8), %s180_s19, 128  }
  0x3a   : > { %543 = vsyncadd (%p646_p8), %s180_s19, 4294967168  ;;  %v575_v0 = vmov 0.0   ;;  %vm576_vm0 = vmmov 0   ;;  %v577_v1 = vmov 0   ;;  %v457_v2 = vld [vmem:[%s183_s21] sm:$0xff]   ;;  %vm222_vm1 = vcmask 130048  }
  0x3b   : > { %383 = vmatprep.subr.bf16.mxu0 %v575_v0  ;;  %385 = vmatprep.mubr.msk.bf16.mxu0 %vm576_vm0, %v575_v0  ;;  %v210_v3 = vld [vmem:[%s780_s2] sm:$0xff]  ;;  %s377_s24 = sshll.u32 %s562_s15, 7  ;;  %s205_s22 = scalar_lea.vmem [#allocation5], %s372_s18 }
  0x3c   : > { %456 = vset.pattern.permute.xlu0 %v577_v1  ;;  %384 = vmatpush3.bf16.msra.mxu0 %v457_v2  ;;  %v207_v4 = vld [vmem:[%s779_s1] sm:$0xf]  ;;  %s283_s23 = sshll.u32 %s205_s22, 4  ;;  %s729_s30 = scalar_lea.hbm %s781_s3, %s377_s24  ;;  %s731_s23 = int_to_ptr.vmem [resolvable:$true] %s283_s23 }
  0x3d   : > { %213 = vperm.xlu0 %456, %v210_v3   ;;  %s269_s4 = scalar_lea.sflag [#allocation4], %s711_s11  ;;  %s488_s15 = scalar_lea.vmem %s731_s23, 128 }
  0x3e   : > { %p489_p8 = scmp.ne.s32.totalorder %s731_s23, %s488_s15  ;;  %p789_p9 = scmp.ne.s32.totalorder %s785_s25, 0 }
  0x3f   : > { %386 = vmatmul.mubr.msk.bf16.vlgmr.msra.gmra.mrb[0].mxu0 %vm222_vm1, %v207_v4  ;;  %s578_s5 = smov [#allocation5]  }
  0x40   : > { %p490_p11 = pnand %p489_p8, %p789_p9  ;;  %s492_s7 = sshll.u32 %s578_s5, 4  ;;  %s493_s7 = int_to_ptr.vmem [resolvable:$false] %s492_s7 }
  0x41   : > { %s494_s18 = scalar_lea.vmem %s493_s7, 256  ;;  %p495_p6 = scmp.lt.s32.totalorder %s731_s23, %s493_s7 }
  0x42   : > { %p491_p0 = pneg %p490_p11  ;;  %p496_p13 = scmp.lt.s32.totalorder %s494_s18, %s488_s15 }
  0x44   : > { %p497_p2 = por %p496_p13, %p495_p6 }
  0x46   : > { %p498_p5 = pnand %p497_p2, %p491_p0 }
  0xbc   : > { %v214_v5 = vpop.permute.xlu0 %213 }
 0x112   : > { %v260_v6 = vpop.f32.mrb[0].mxu0 }
 0x113   : > { %v261_v7 = vadd.f32 %v260_v6, %v214_v5  ;;  %v387_v8 = vpop.f32.mrb[1].mxu0 }
 0x114   : > { %v263_v9 = vpop.f32.mrb[2].mxu0 }
 0x115   : > { %v266_v10 = vmax.f32 %v261_v7, 0.0  ;;  %v388_v11 = vpop.f32.mrb[3].mxu0 }
 0x117   : > { %267 = vst [vmem:[%s205_s22] sm:$0xff] %v266_v10 }
 0x118   : > { %501 = shalt.err (!%p498_p5)
}
 0x119   : > { %s502_s11 = scalar_lea.hbm %s729_s30, 128  ;;  %s506_s6 = scalar_lea.hbm %s781_s3, 256 }
 0x11a   : > { %p503_p4 = scmp.ne.s32.totalorder %s729_s30, %s502_s11  ;;  %p507_p12 = scmp.lt.u32.totalorder %s729_s30, %s781_s3 }
 0x11b   : > { %p508_p1 = scmp.lt.u32.totalorder %s506_s6, %s502_s11  ;;  %p510_p8 = scmp.lt.u32.totalorder %s502_s11, %s729_s30 }
 0x11c   : > { %p504_p7 = pnand %p503_p4, %p789_p9 }
 0x11d   : > { %p509_p3 = por %p508_p1, %p507_p12 }
 0x11e   : > { %p505_p10 = pneg %p504_p7 }
 0x11f   : > { %p511_p11 = por %p510_p8, %p509_p3 }
 0x121   : > { %p512_p0 = pnand %p511_p11, %p505_p10 }
 0x123   : > { %515 = shalt.err (!%p512_p0)
}
 0x124   : > { %391 = dma.vmem_to_hbm [thread:$0]  (%p789_p9), %s731_s23, 128, %s729_s30, %s269_s4  }
 0x125 PF: > { %s295_s10 = sand.u32 1, %s550_s12   ;;  %p790_p6 = scmp.ne.s32.totalorder %s786_s27, 0 }
 0x126   : > { %p791_p13 = scmp.ge.s32.totalorder %s570_s17, 2  ;;  %s296_s24 = scalar_lea.sflag [#allocation4], %s295_s10 }
 0x128   : > { %p398_p2 = pnand %p791_p13, %p790_p6 }
 0x12a   : > { %545 = dma.done.wait (!%p398_p2), %s296_s24, 128  }
 0x12b   : > { %547 = vsyncadd (!%p398_p2), %s296_s24, 4294967168  ;;  %s19_s17 = sadd.s32 1, %s570_s17   ;;  %s792_s12 = smov %s554_s13 }
 0x12c   : > { %p16_p5 = scmp.ge.s32.totalorder %s19_s17, 4   ;;  %s793_s13 = smov %s558_s14 }
 0x12d   : > { %s794_s14 = smov %s655_s26  ;;  %s795_s15 = smov %s566_s16 }
 0x12e   : > { %s796_s16 = smov %s798_s20  ;;  %18 = sbr.rel (!%p16_p5) target bundleno = 6 (0x6), region = 77 }
 0x135   :  { %301 = vsyncpa [#allocation3], 1 }
 0x136   :  { %303 = vsyncpa [#allocation3 + $0x1], 1 }
 0x137   :  { %304 = vsyncpa [#allocation4], 1 }
 0x138   :  { %306 = vsyncpa [#allocation4 + $0x1], 1 }

</bundles_post_ra>
